<compile_context>
chip_gen: v7x
topology: tpu7x:2x2x1
jax: 0.10.0
libtpu: 0.0.40
codegen_flags: <defaults>
</compile_context>

<pallas_src>
import math
import functools

import jax
import jax.numpy as jnp
from jax import lax
from jax.experimental import pallas as pl
from jax.experimental.pallas import tpu as pltpu


def _split_hi_lo(x_f32):
    """Split f32 into (hi, lo) bf16 so that hi + lo reconstructs x to ~16 mantissa bits."""
    hi = x_f32.astype(jnp.bfloat16)
    lo = (x_f32 - hi.astype(jnp.float32)).astype(jnp.bfloat16)
    return hi, lo


# ---------------------------------------------------------------------------
# Kernel 1: feature projection + gather-target construction (row tiled).
# ---------------------------------------------------------------------------
def _project_kernel(feat_ref, vert_ref, W_ref, b_ref, cent_ref, targ_ref, *, c3o):
    f32, bf16 = jnp.float32, jnp.bfloat16
    proj = jnp.dot(feat_ref[0], W_ref[...], preferred_element_type=f32) + b_ref[...]
    cent_ref[0] = proj[:, :c3o]                                   # (tq, 3*oc) f32
    v_hi, v_lo = _split_hi_lo(vert_ref[0])                        # (tq, 3) bf16 each
    # gather targets: [q|k|v support features (bf16) | xyz hi | xyz lo]
    targ_ref[0] = jnp.concatenate([proj[:, c3o:].astype(bf16), v_hi, v_lo], axis=1)


# ---------------------------------------------------------------------------
# Kernel 2: neighbor gather / theta / max / support-sum / fused q,k,v projection.
# ---------------------------------------------------------------------------
def _fuse_kernel(nbr_ref, vert_ref, cent_ref, targ_ref,
                 D_ref, S_ref, Wqkv_ref, bqkv_ref, out_ref, *, c3, unroll):
    f32, bf16 = jnp.float32, jnp.bfloat16
    nbr_f = nbr_ref[0]                      # (tq, N) f32 neighbor ids (exact ints)
    verts = vert_ref[0]                     # (tq, 3)  f32
    targets = targ_ref[0]                   # (V, c3 + 6) bf16 gather source (full batch)
    tq, N = nbr_f.shape
    V = targets.shape[0]

    # Center coordinates split exactly like the project kernel -> exact cancellation
    # (d == 0) for self-neighbors.
    v_hi, v_lo = _split_hi_lo(verts)
    v_center = v_hi.astype(f32) + v_lo.astype(f32)                # (tq, 3) f32

    D0 = D_ref[0:1, :]
    D1 = D_ref[1:2, :]
    D2 = D_ref[2:3, :]

    # hoisted once per row tile
    col_iota = lax.broadcasted_iota(jnp.int32, (tq, V), 1).astype(f32)
    sel_iota = lax.broadcasted_iota(jnp.int32, (N, 1), 0)

    def body(j, run_max):
        # Column j of the neighbor ids as a (tq, 1) vector via a tiny MXU matmul
        # (exact: one-hot selection of integer-valued floats). Keeps XLU/VALU free.
        ej = (sel_iota == j).astype(f32)                                     # (N, 1)
        idx_j = jnp.dot(nbr_f, ej, preferred_element_type=f32)               # (tq, 1)
        onehot = (col_iota == idx_j).astype(bf16)                            # (tq, V)
        # One-hot gather over [supports | xyz_hi | xyz_lo] on the MXU (exact selection).
        g = jnp.dot(onehot, targets, preferred_element_type=f32)             # (tq, c3+6)
        sup_g = g[:, :c3]
        xyz = g[:, c3:c3 + 3] + g[:, c3 + 3:]                                # hi + lo (f32)
        d = xyz - v_center
        inv_n = lax.rsqrt(jnp.maximum(jnp.sum(d * d, axis=1, keepdims=True), 1e-24))
        dn = d * inv_n
        # theta = relu(dn @ D) on the VPU (contraction dim is 3), MXU stays on the gather.
        theta = jnp.maximum(dn[:, 0:1] * D0 + dn[:, 1:2] * D1 + dn[:, 2:3] * D2, 0.0)
        return jnp.maximum(run_max, theta * sup_g)

    # -inf init is safe because N >= 1 (matches torch.max over the neighbor axis).
    act_max = lax.fori_loop(0, N, body, jnp.full((tq, c3), -jnp.inf, f32),
                            unroll=unroll)

    # Support-sum via block-identity matmul, kept in f32 (exact, negligible MXU time).
    fused = cent_ref[0] + jnp.dot(act_max, S_ref[...], preferred_element_type=f32)

    # Fused q/k/v input projection of the MHA (block-diagonal weight, 1/sqrt(dk) folded
    # into the query block in the wrapper).
    qkv = jnp.dot(fused.astype(bf16), Wqkv_ref[...],
                  preferred_element_type=f32) + bqkv_ref[...]
    out_ref[0] = qkv.astype(out_ref.dtype)


# ---------------------------------------------------------------------------
# Kernel 3: multi-head attention over the full key/value set, row-tiled queries.
# ---------------------------------------------------------------------------
def _mha_kernel(qkv_q_ref, qkv_kv_ref, Wo_ref, bo_ref, out_ref, *, oc, heads):
    f32, bf16 = jnp.float32, jnp.bfloat16
    dk = oc // heads
    q_all = qkv_q_ref[0, :, 0:oc].astype(bf16)              # (tq, oc), scale pre-folded
    k_all = qkv_kv_ref[0, :, oc:2 * oc].astype(bf16)        # (V, oc)
    v_all = qkv_kv_ref[0, :, 2 * oc:3 * oc].astype(bf16)    # (V, oc)

    head_out = []
    for h in range(heads):                                   # static, small
        sl = slice(h * dk, (h + 1) * dk)
        s = jnp.einsum('qd,kd->qk', q_all[:, sl], k_all[:, sl],
                       preferred_element_type=f32)           # (tq, V)
        s = s - jnp.max(s, axis=-1, keepdims=True)
        p = jnp.exp(s)
        p = p * pl.reciprocal(jnp.sum(p, axis=-1, keepdims=True), approx=True)
        head_out.append(jnp.dot(p.astype(bf16), v_all[:, sl],
                                preferred_element_type=f32))  # (tq, dk)

    x = jnp.concatenate(head_out, axis=-1).astype(bf16)       # (tq, oc)
    out = jnp.dot(x, Wo_ref[...], preferred_element_type=f32) + bo_ref[...]
    out_ref[0] = out.astype(out_ref.dtype)


# ---------------------------------------------------------------------------
# Wrapper.
# ---------------------------------------------------------------------------
def _pick_row_tile(V, target=256):
    if V <= target:
        return V
    for t in range(target, 7, -8):
        if V % t == 0 and t % 8 == 0:
            return t
    return V


def _default_vmem_limit_bytes():
    try:
        kind = jax.devices()[0].device_kind.lower()
    except Exception:
        kind = ""
    if "v7" in kind:
        return 48 * 1024 * 1024      # leave headroom below v7x's 64 MiB physical VMEM
    return 100 * 1024 * 1024          # v5e / v6e have 128 MiB physical VMEM


def _block_diag3(A, B, C):
    n = A.shape[0]
    Z = jnp.zeros((n, n), A.dtype)
    return jnp.concatenate([
        jnp.concatenate([A, Z, Z], axis=1),
        jnp.concatenate([Z, B, Z], axis=1),
        jnp.concatenate([Z, Z, C], axis=1)], axis=0)


def attention_conv_layer(neighbor_index, vertices, feature_map, params, *,
                         out_channel, support_num, heads=4,
                         row_tile=None, neighbor_unroll=2, vmem_limit_bytes=None):
    bs, V, N = neighbor_index.shape
    C_in = feature_map.shape[-1]
    oc = out_channel
    assert oc % heads == 0
    dk = oc // heads
    soc = support_num * oc
    c3 = 3 * soc
    c3o = 3 * oc
    tgt_w = c3 + 6
    f32, bf16 = jnp.float32, jnp.bfloat16

    if row_tile is None:
        row_tile = _pick_row_tile(V)
    tq = row_tile
    assert V % tq == 0, "vertice_num must be divisible by row_tile"
    R = V // tq
    if vmem_limit_bytes is None:
        vmem_limit_bytes = _default_vmem_limit_bytes()

    # ---- one-time (trace-level) parameter preparation, outside the kernels ----
    def norm_cols(D):
        return D / jnp.maximum(jnp.linalg.norm(D, axis=0, keepdims=True), 1e-12)

    D_all = jnp.concatenate([norm_cols(params['query_directions']),
                             norm_cols(params['key_directions']),
                             norm_cols(params['value_directions'])], axis=1)   # (3, c3)

    def split_wb(prefix):
        W, b = params[prefix + '_weights'], params[prefix + '_bias']
        return W[:, :oc], W[:, oc:], b[:oc], b[oc:]

    qWc, qWs, qbc, qbs = split_wb('query')
    kWc, kWs, kbc, kbs = split_wb('key')
    vWc, vWs, vbc, vbs = split_wb('value')
    Wc = jnp.concatenate([qWc, kWc, vWc], axis=1)                   # (C_in, 3*oc)
    Ws = jnp.concatenate([qWs, kWs, vWs], axis=1)                   # (C_in, 3*soc)
    W_all = jnp.concatenate([Wc, Ws], axis=1).astype(f32)           # (C_in, 3*oc + 3*soc)
    b_all = jnp.concatenate([qbc, kbc, vbc, qbs, kbs, vbs]).reshape(1, -1).astype(f32)

    # block-identity support-sum matrix (3*soc, 3*oc), kept f32 (exact, cheap matmul)
    S = jnp.kron(jnp.eye(3, dtype=f32),
                 jnp.tile(jnp.eye(oc, dtype=f32), (support_num, 1)))

    inv_sqrt_dk = 1.0 / math.sqrt(dk)
    Wqkv = _block_diag3(params['mha_wq'] * inv_sqrt_dk,
                        params['mha_wk'], params['mha_wv']).astype(bf16)      # (3oc, 3oc)
    bqkv = jnp.concatenate([params['mha_bq'] * inv_sqrt_dk,
                            params['mha_bk'], params['mha_bv']]).reshape(1, -1).astype(f32)
    Wo = params['mha_wo'].astype(bf16)
    bo = params['mha_bo'].reshape(1, -1).astype(f32)

    nbr_f = neighbor_index.astype(f32)        # exact for V < 2^24
    verts = vertices.astype(f32)
    feats = feature_map.astype(f32)

    def tile_spec(last):
        return pl.BlockSpec((1, tq, last), lambda b, r: (b, r, 0))

    def batch_spec(last):
        return pl.BlockSpec((1, V, last), lambda b, r: (b, 0, 0))

    def full_spec(arr):
        nd = arr.ndim
        return pl.BlockSpec(arr.shape, lambda b, r, _nd=nd: (0,) * _nd)

    cp = pltpu.CompilerParams(
        dimension_semantics=("parallel", "parallel"),
        vmem_limit_bytes=vmem_limit_bytes)

    # ---- kernel 1: projection + gather targets -------------------------------
    proj_cost = pl.CostEstimate(
        flops=2 * bs * V * C_in * (c3o + c3),
        transcendentals=0,
        bytes_accessed=bs * V * ((C_in + 3 + c3o) * 4 + tgt_w * 2)
                       + (C_in + 1) * (c3o + c3) * 4)
    centers, targets = pl.pallas_call(
        functools.partial(_project_kernel, c3o=c3o),
        out_shape=(jax.ShapeDtypeStruct((bs, V, c3o), f32),
                   jax.ShapeDtypeStruct((bs, V, tgt_w), bf16)),
        grid_spec=pltpu.PrefetchScalarGridSpec(
            num_scalar_prefetch=0, grid=(bs, R),
            in_specs=[tile_spec(C_in), tile_spec(3),
                      full_spec(W_all), full_spec(b_all)],
            out_specs=(tile_spec(c3o), tile_spec(tgt_w))),
        compiler_params=cp,
        cost_estimate=proj_cost,
    )(feats, verts, W_all, b_all)

    # ---- kernel 2: neighbor gather / fuse / q,k,v projection -----------------
    fuse_cost = pl.CostEstimate(
        flops=2 * bs * N * V * (V * tgt_w + N + 4 * c3)
              + 2 * bs * V * (c3 * c3o + c3o * c3o),
        transcendentals=bs * N * V,
        bytes_accessed=bs * V * ((N + 3 + 2 * c3o) * 4 + tgt_w * 2)
                       + (3 * c3 + c3 * c3o) * 4 + c3o * c3o * 2)
    qkv = pl.pallas_call(
        functools.partial(_fuse_kernel, c3=c3, unroll=neighbor_unroll),
        out_shape=jax.ShapeDtypeStruct((bs, V, c3o), f32),
        grid_spec=pltpu.PrefetchScalarGridSpec(
            num_scalar_prefetch=0, grid=(bs, R),
            in_specs=[tile_spec(N), tile_spec(3), tile_spec(c3o),
                      batch_spec(tgt_w),
                      full_spec(D_all), full_spec(S),
                      full_spec(Wqkv), full_spec(bqkv)],
            out_specs=tile_spec(c3o)),
        compiler_params=cp,
        cost_estimate=fuse_cost,
    )(nbr_f, verts, centers, targets, D_all, S, Wqkv, bqkv)

    # ---- kernel 3: multi-head attention + output projection -------------------
    # TODO(synk): for extremely large V, additionally stream K/V (flash-style) and tile
    # the gather source in kernel 2; the current full-per-batch K/V targets small/medium V.
    mha_cost = pl.CostEstimate(
        flops=4 * bs * heads * V * V * dk + 2 * bs * V * oc * oc,
        transcendentals=bs * heads * V * V,
        bytes_accessed=2 * bs * V * c3o * 4 + bs * V * oc * 4 + (oc + 1) * oc * 2)
    out = pl.pallas_call(
        functools.partial(_mha_kernel, oc=oc, heads=heads),
        out_shape=jax.ShapeDtypeStruct((bs, V, oc), f32),
        grid_spec=pltpu.PrefetchScalarGridSpec(
            num_scalar_prefetch=0, grid=(bs, R),
            in_specs=[tile_spec(c3o), batch_spec(c3o),
                      full_spec(Wo), full_spec(bo)],
            out_specs=tile_spec(oc)),
        compiler_params=cp,
        cost_estimate=mha_cost,
    )(qkv, qkv, Wo, bo)
    return out


# ---------------------------------------------------------------------------
# Pure-JAX reference (mirrors the PyTorch forward) for verification.
# ---------------------------------------------------------------------------
def reference_forward(nbr, verts, feat, params, *, out_channel, support_num, heads):
    oc, s, h = out_channel, support_num, heads
    bs, V, N = nbr.shape
    dk = oc // h
    hp = lax.Precision.HIGHEST
    gather = jax.vmap(lambda t, i: t[i])                     # (V,d),(V,N)->(V,N,d)

    neighbors = gather(verts, nbr)
    d = neighbors - verts[:, :, None, :]
    dn = d / jnp.maximum(jnp.linalg.norm(d, axis=-1, keepdims=True), 1e-12)

    def branch(W, B, D):
        Dn = D / jnp.maximum(jnp.linalg.norm(D, axis=0, keepdims=True), 1e-12)
        theta = jnp.maximum(jnp.einsum('bvnc,cd->bvnd', dn, Dn, precision=hp), 0.0)
        fo = jnp.einsum('bvc,cd->bvd', feat, W, precision=hp) + B
        center, sup = fo[..., :oc], fo[..., oc:]
        sup_nb = gather(sup, nbr)
        act = (theta * sup_nb).reshape(bs, V, N, s, oc)
        act = jnp.max(act, axis=2).sum(axis=2)
        return center + act

    qf = branch(params['query_weights'], params['query_bias'], params['query_directions'])
    kf = branch(params['key_weights'], params['key_bias'], params['key_directions'])
    vf = branch(params['value_weights'], params['value_bias'], params['value_directions'])

    def lin(x, W, b):
        return jnp.einsum('bvd,de->bve', x, W, precision=hp) + b

    def split(x):
        return x.reshape(bs, V, h, dk).transpose(0, 2, 1, 3)

    q = split(lin(qf, params['mha_wq'], params['mha_bq']))
    k = split(lin(kf, params['mha_wk'], params['mha_bk']))
    v = split(lin(vf, params['mha_wv'], params['mha_bv']))
    scores = jnp.einsum('bhqd,bhkd->bhqk', q, k, precision=hp) / math.sqrt(dk)
    p = jax.nn.softmax(scores, axis=-1)
    x = jnp.einsum('bhqk,bhkd->bhqd', p, v, precision=hp)
    x = x.transpose(0, 2, 1, 3).reshape(bs, V, oc)
    return lin(x, params['mha_wo'], params['mha_bo'])


if __name__ == "__main__":
    IN_C, OUT_C, SUPPORT = 8, 32, 3
    BS, V, N, H = 2, 16, 8, 4

    key = jax.random.PRNGKey(0)
    ks = jax.random.split(key, 24)

    def u(k, shape, s):
        return jax.random.uniform(k, shape, jnp.float32, -s, s)

    stdv = 1.0 / math.sqrt(OUT_C * (SUPPORT + 1))
    stdv_m = 1.0 / math.sqrt(OUT_C * OUT_C)
    bias_b = 1.0 / math.sqrt(OUT_C)

    params = {
        'query_weights': u(ks[0], (IN_C, (SUPPORT + 1) * OUT_C), stdv),
        'query_bias':    u(ks[1], ((SUPPORT + 1) * OUT_C,), stdv),
        'query_directions': u(ks[2], (3, SUPPORT * OUT_C), stdv),
        'key_weights':   u(ks[3], (IN_C, (SUPPORT + 1) * OUT_C), stdv),
        'key_bias':      u(ks[4], ((SUPPORT + 1) * OUT_C,), stdv),
        'key_directions':   u(ks[5], (3, SUPPORT * OUT_C), stdv),
        'value_weights': u(ks[6], (IN_C, (SUPPORT + 1) * OUT_C), stdv),
        'value_bias':    u(ks[7], ((SUPPORT + 1) * OUT_C,), stdv),
        'value_directions': u(ks[8], (3, SUPPORT * OUT_C), stdv),
        # MultiHeadedAttention linears (stored pre-transposed: y = x @ W + b)
        'mha_wq': u(ks[9],  (OUT_C, OUT_C), stdv_m), 'mha_bq': u(ks[10], (OUT_C,), bias_b),
        'mha_wk': u(ks[11], (OUT_C, OUT_C), stdv_m), 'mha_bk': u(ks[12], (OUT_C,), bias_b),
        'mha_wv': u(ks[13], (OUT_C, OUT_C), stdv_m), 'mha_bv': u(ks[14], (OUT_C,), bias_b),
        'mha_wo': u(ks[15], (OUT_C, OUT_C), stdv_m), 'mha_bo': u(ks[16], (OUT_C,), bias_b),
    }

    neighbor_index = jax.random.randint(ks[20], (BS, V, N), 0, V, dtype=jnp.int32)
    vertices = jax.random.normal(ks[21], (BS, V, 3), jnp.float32)
    feature_map = jax.random.normal(ks[22], (BS, V, IN_C), jnp.float32)

    out = attention_conv_layer(neighbor_index, vertices, feature_map, params,
                               out_channel=OUT_C, support_num=SUPPORT, heads=H,
                               neighbor_unroll=2)
    out = jax.block_until_ready(out)

    ref = reference_forward(neighbor_index, vertices, feature_map, params,
                            out_channel=OUT_C, support_num=SUPPORT, heads=H)
    ref = jax.block_until_ready(ref)

    assert out.shape == (BS, V, OUT_C)
    assert bool(jnp.all(jnp.isfinite(out)))
    assert bool(jnp.allclose(out, ref, atol=1e-3, rtol=2e-2)), "mismatch vs. JAX reference"

    print("KERNEL_OK")
</pallas_src>

<mosaic_0001>
module attributes {stable_mosaic.version = 11 : i64} {
  func.func @_project_kernel(%arg0: i32, %arg1: i32, %arg2: memref<1x16x8xf32, #tpu.memory_space<vmem>>, %arg3: memref<1x16x3xf32, #tpu.memory_space<vmem>>, %arg4: memref<8x384xf32, #tpu.memory_space<vmem>>, %arg5: memref<1x384xf32, #tpu.memory_space<vmem>>, %arg6: memref<1x16x96xf32, #tpu.memory_space<vmem>>, %arg7: memref<1x16x294xbf16, #tpu.memory_space<vmem>>) attributes {dimension_semantics = [#tpu.dimension_semantics<parallel>, #tpu.dimension_semantics<parallel>], iteration_bounds = array<i64: 2, 1>, scalar_prefetch = 0 : i64, scratch_operands = 0 : i64, tpu.core_type = #tpu.core_type<tc>, window_params = [{transform_indices = @transform_0, window_bounds = array<i64: 1, 16, 8>}, {transform_indices = @transform_1, window_bounds = array<i64: 1, 16, 3>}, {pipeline_mode = #tpu.pipeline_mode<synchronous>, transform_indices = @transform_2, window_bounds = array<i64: 8, 384>}, {pipeline_mode = #tpu.pipeline_mode<synchronous>, transform_indices = @transform_3, window_bounds = array<i64: 1, 384>}, {transform_indices = @transform_4, window_bounds = array<i64: 1, 16, 96>}, {transform_indices = @transform_5, window_bounds = array<i64: 1, 16, 294>}]} {
    %c0 = arith.constant 0 : index
    %c0_0 = arith.constant 0 : index
    %c0_1 = arith.constant 0 : index
    %0 = vector.load %arg2[%c0, %c0_0, %c0_1] : memref<1x16x8xf32, #tpu.memory_space<vmem>>, vector<1x16x8xf32>
    %1 = vector.shape_cast %0 : vector<1x16x8xf32> to vector<16x8xf32>
    %c0_2 = arith.constant 0 : index
    %c0_3 = arith.constant 0 : index
    %2 = vector.load %arg4[%c0_2, %c0_3] : memref<8x384xf32, #tpu.memory_space<vmem>>, vector<8x384xf32>
    %cst = arith.constant dense<0.000000e+00> : vector<16x384xf32>
    %3 = tpu.matmul %1, %2, %cst {dimension_numbers = #tpu.dot_dimension_numbers<[1], [0], [0], [1], [0, 0, 1, 1], [], []>} : vector<16x8xf32>, vector<8x384xf32>, vector<16x384xf32> -> vector<16x384xf32>
    %c0_4 = arith.constant 0 : index
    %c0_5 = arith.constant 0 : index
    %4 = vector.load %arg5[%c0_4, %c0_5] : memref<1x384xf32, #tpu.memory_space<vmem>>, vector<1x384xf32>
    %5 = vector.broadcast %4 : vector<1x384xf32> to vector<16x384xf32>
    %6 = arith.addf %3, %5 : vector<16x384xf32>
    %7 = vector.extract_strided_slice %6 {offsets = [0, 0], sizes = [16, 96], strides = [1, 1]} : vector<16x384xf32> to vector<16x96xf32>
    %c0_6 = arith.constant 0 : index
    %c0_7 = arith.constant 0 : index
    %c0_8 = arith.constant 0 : index
    %8 = vector.load %arg6[%c0_6, %c0_7, %c0_8] : memref<1x16x96xf32, #tpu.memory_space<vmem>>, vector<1x16x96xf32>
    %9 = vector.shape_cast %8 : vector<1x16x96xf32> to vector<16x96xf32>
    %10 = vector.shape_cast %7 : vector<16x96xf32> to vector<1x16x96xf32>
    tpu.vector_store %arg6[%c0_6, %c0_7, %c0_8], %10 {strides = array<i32>} : memref<1x16x96xf32, #tpu.memory_space<vmem>>, vector<1x16x96xf32>,
    %c0_9 = arith.constant 0 : index
    %c0_10 = arith.constant 0 : index
    %c0_11 = arith.constant 0 : index
    %11 = vector.load %arg3[%c0_9, %c0_10, %c0_11] : memref<1x16x3xf32, #tpu.memory_space<vmem>>, vector<1x16x3xf32>
    %12 = vector.shape_cast %11 : vector<1x16x3xf32> to vector<16x3xf32>
    %13 = arith.truncf %12 : vector<16x3xf32> to vector<16x3xbf16>
    %14 = arith.extf %13 : vector<16x3xbf16> to vector<16x3xf32>
    %15 = arith.subf %12, %14 : vector<16x3xf32>
    %16 = arith.truncf %15 : vector<16x3xf32> to vector<16x3xbf16>
    %17 = vector.extract_strided_slice %6 {offsets = [0, 96], sizes = [16, 288], strides = [1, 1]} : vector<16x384xf32> to vector<16x288xf32>
    %18 = arith.truncf %17 : vector<16x288xf32> to vector<16x288xbf16>
    %19 = tpu.concatenate %18, %13, %16 in 1 : vector<16x288xbf16>, vector<16x3xbf16>, vector<16x3xbf16> -> vector<16x294xbf16>
    %c0_12 = arith.constant 0 : index
    %c0_13 = arith.constant 0 : index
    %c0_14 = arith.constant 0 : index
    %20 = vector.load %arg7[%c0_12, %c0_13, %c0_14] : memref<1x16x294xbf16, #tpu.memory_space<vmem>>, vector<1x16x294xbf16>
    %21 = vector.shape_cast %20 : vector<1x16x294xbf16> to vector<16x294xbf16>
    %22 = vector.shape_cast %19 : vector<16x294xbf16> to vector<1x16x294xbf16>
    tpu.vector_store %arg7[%c0_12, %c0_13, %c0_14], %22 {strides = array<i32>} : memref<1x16x294xbf16, #tpu.memory_space<vmem>>, vector<1x16x294xbf16>,
    return
  }
  func.func @transform_0(%arg0: i32, %arg1: i32) -> (i32, i32, i32) {
    %c0_i32 = arith.constant 0 : i32
    %c0_i32_0 = arith.constant 0 : i32
    return %arg0, %arg1, %c0_i32 : i32, i32, i32
  }
  func.func @transform_1(%arg0: i32, %arg1: i32) -> (i32, i32, i32) {
    %c0_i32 = arith.constant 0 : i32
    %c0_i32_0 = arith.constant 0 : i32
    return %arg0, %arg1, %c0_i32 : i32, i32, i32
  }
  func.func @transform_2(%arg0: i32, %arg1: i32) -> (i32, i32) {
    %c0_i32 = arith.constant 0 : i32
    %c0_i32_0 = arith.constant 0 : i32
    %c0_i32_1 = arith.constant 0 : i32
    return %c0_i32, %c0_i32_0 : i32, i32
  }
  func.func @transform_3(%arg0: i32, %arg1: i32) -> (i32, i32) {
    %c0_i32 = arith.constant 0 : i32
    %c0_i32_0 = arith.constant 0 : i32
    %c0_i32_1 = arith.constant 0 : i32
    return %c0_i32, %c0_i32_0 : i32, i32
  }
  func.func @transform_4(%arg0: i32, %arg1: i32) -> (i32, i32, i32) {
    %c0_i32 = arith.constant 0 : i32
    %c0_i32_0 = arith.constant 0 : i32
    return %arg0, %arg1, %c0_i32 : i32, i32, i32
  }
  func.func @transform_5(%arg0: i32, %arg1: i32) -> (i32, i32, i32) {
    %c0_i32 = arith.constant 0 : i32
    %c0_i32_0 = arith.constant 0 : i32
    return %arg0, %arg1, %c0_i32 : i32, i32, i32
  }
}

</mosaic_0001>

<bundles_post_ra>
// kernel: tpu_custom_call.1
= control target key start
LH: loop header
LB: loop body
LE: loop exit
PB: predicated region body
PF: predicated region fallthrough
CT: control target
= control target key end

     0   :  { %s1589_s0 = inlined_call_operand.hbm [shape: f32[2,16,8], index: 0, kind: input, shape index: {}]   ;;  %s1590_s1 = inlined_call_operand.hbm [shape: f32[2,16,3], index: 1, kind: input, shape index: {}]   ;;  %s1591_s2 = inlined_call_operand.hbm [shape: f32[8,384], index: 2, kind: input, shape index: {}]   ;;  %s1592_s3 = inlined_call_operand.hbm [shape: f32[1,384], index: 3, kind: input, shape index: {}]   ;;  %s1593_s4 = inlined_call_operand.hbm [shape: f32[2,16,96], index: 4, kind: output, shape index: {0}]   ;;  %s1594_s5 = inlined_call_operand.hbm [shape: bf16[2,16,294], index: 5, kind: output, shape index: {1}]  }
   0x1   :  { %1602 = sst [smem:[#allocation20_spill]] %s1589_s0 }
   0x2   :  { %1603 = sst [smem:[#allocation21_spill]] %s1591_s2 }
   0x3   :  { %1604 = sst [smem:[#allocation22_spill]] %s1592_s3 }
   0x4   :  { %11 = vsyncpa [#allocation3], 0 }
   0x5   :  { %13 = vsyncpa [#allocation3 + $0x1], 0 }
   0x6   :  { %14 = vsyncpa [#allocation6], 0 }
   0x7   :  { %16 = vsyncpa [#allocation6 + $0x1], 0 }
   0x8   :  { %17 = vsyncpa [#allocation9], 0 }
   0x9   :  { %18 = vsyncpa [#allocation4], 0 }
   0xa   :  { %20 = vsyncpa [#allocation4 + $0x1], 0 }
   0xb   :  { %21 = vsyncpa [#allocation12], 0 }
   0xc   :  { %23 = vsyncpa [#allocation12 + $0x1], 0  ;;  %s1230_s18 = smov 0   ;;  %s1232_s19 = smov 0  }
   0xd   :  { %s1234_s20 = smov 0   ;;  %s1236_s21 = smov 0  }
   0xe   :  { %s1238_s22 = smov 0   ;;  %s1240_s23 = smov 0  }
   0xf LB: > { %s1261_s24 = sadd.s32 4294967295, %s1183_s23   ;;  %s795_s25 = sadd.s32 4294967294, %s1183_s23   ;;  %s1183_s23 = sphi %s1240_s23, %s29_s23   ;;  %s1179_s22 = sphi %s1238_s22, %s1632_s22   ;;  %s1175_s21 = sphi %s1236_s21, %s1631_s21   ;;  %s1171_s20 = sphi %s1234_s20, %s1630_s20   ;;  %s1167_s19 = sphi %s1232_s19, %s1629_s19   ;;  %s1163_s18 = sphi %s1230_s18, %s1628_s18  }
  0x10   : > { %s50_s26 = sadd.s32 1, %s1171_s20  ;;  %p57_p0 = scmp.ne.s32.totalorder %s1171_s20, %s1167_s19 }
  0x11   : > { %p58_p1 = scmp.eq.s32.totalorder %s1183_s23, 0  ;;  %p63_p2 = scmp.ne.s32.totalorder %s1167_s19, %s1163_s18 }
  0x12   : > { %p1595_p3 = scmp.eq.s32.totalorder %s1261_s24, 0  ;;  %p159_p4 = scmp.eq.s32.totalorder %s1261_s24, 1 }
  0x13   : > { %p1272_p5 = por %p58_p1, %p57_p0  ;;  %p165_p6 = scmp.eq.s32.totalorder %s795_s25, 1 }
  0x14   : > { %p1278_p7 = por %p1595_p3, %p63_p2  ;;  %p1282_p8 = por %p159_p4, %p57_p0 }
  0x15   : > { %p1286_p9 = por %p165_p6, %p63_p2  ;;  %p796_p10 = scmp.ge.s32.totalorder %s1183_s23, 1 }
  0x16   : > { %s1606_s28 = scalar_select %p1278_p7, 1, 0 }
  0x17   : > { %s1607_s29 = scalar_select %p1282_p8, 1, 0 }
  0x18   : > { %s1608_s30 = scalar_select %p1286_p9, 1, 0 }
  0x19   : > { %p200_p11 = scmp.lt.s32.totalorder %s1183_s23, 3  ;;  %s1185_s7 = smov [#allocation7]  }
  0x1a   : > { %s213_s8 = sshll.u32 %s1185_s7, 4  ;;  %p878_p1 = scmp.lt.s32.totalorder %s1183_s23, 2  ;;  %s214_s8 = int_to_ptr.vmem [resolvable:$true] %s213_s8 }
  0x1b   : > { %p1293_p13 = pnand %p796_p10, %p200_p11  ;;  %s1186_s10 = smov [#allocation8]  }
  0x1c   : > { %p1302_p4 = pnand %p878_p1, %p1272_p5  ;;  %s224_s11 = sshll.u32 %s1186_s10, 4  ;;  %s1312_s11 = int_to_ptr.vmem [resolvable:$true] %s224_s11 }
  0x1d   : > { %s1609_s6 = scalar_select %p1293_p13, 1, 0 }
  0x1e   : > { %p855_p0 = pneg %p1293_p13  ;;  %s1612_s2 = sld [smem:[#allocation21_spill]] }
  0x1f   : > { %s1610_s9 = scalar_select %p1302_p4, 1, 0 }
  0x20   : > { %p1308_p2 = pnand %p855_p0, %p1595_p3 }
  0x22   : > { %p943_p6 = pneg %p1308_p2 }
  0x24   : > { %s941_s15 = scalar_lea.hbm %s1612_s2, 384 }
  0x25   : > { %p942_p5 = scmp.ne.s32.totalorder %s1612_s2, %s941_s15  ;;  %p948_p1 = scmp.lt.u32.totalorder %s941_s15, %s1612_s2 }
  0x27   : > { %p944_p10 = pnand %p943_p6, %p942_p5 }
  0x29   : > { %p945_p11 = pneg %p944_p10 }
  0x2b   : > { %p950_p0 = pnand %p948_p1, %p945_p11 }
  0x2d   : > { %953 = shalt.err (!%p950_p0)
}
  0x2e   : > { %s954_s7 = scalar_lea.vmem %s214_s8, 384  ;;  %p962_p8 = scmp.lt.s32.totalorder %s214_s8, %s214_s8 }
  0x2f   : > { %p955_p12 = scmp.ne.s32.totalorder %s214_s8, %s954_s7  ;;  %p963_p7 = scmp.lt.s32.totalorder %s954_s7, %s954_s7 }
  0x31   : > { %p957_p3 = pnand %p955_p12, %p943_p6  ;;  %p964_p13 = por %p963_p7, %p962_p8 }
  0x33   : > { %p958_p9 = pneg %p957_p3 }
  0x35   : > { %p965_p4 = pnand %p964_p13, %p958_p9 }
  0x37   : > { %968 = shalt.err (!%p965_p4)
}
  0x38   : > { %858 = dma.hbm_to_vmem [thread:$0]  (!%p1308_p2), %s1612_s2, 384, %s214_s8, [#allocation6]  }
  0x39   : > { %s1613_s3 = sld [smem:[#allocation22_spill]] }
  0x3f   : > { %s969_s16 = scalar_lea.hbm %s1613_s3, 48 }
  0x40   : > { %p970_p3 = scmp.ne.s32.totalorder %s1613_s3, %s969_s16  ;;  %p976_p9 = scmp.lt.u32.totalorder %s969_s16, %s1613_s3 }
  0x42   : > { %p972_p7 = pnand %p970_p3, %p943_p6 }
  0x44   : > { %p973_p8 = pneg %p972_p7 }
  0x46   : > { %p978_p12 = pnand %p976_p9, %p973_p8 }
  0x48   : > { %981 = shalt.err (!%p978_p12)
}
  0x49   : > { %s982_s8 = scalar_lea.vmem %s1312_s11, 48  ;;  %s989_s10 = scalar_lea.vmem %s1312_s11, 64 }
  0x4a   : > { %p983_p13 = scmp.ne.s32.totalorder %s1312_s11, %s982_s8  ;;  %p990_p10 = scmp.lt.s32.totalorder %s1312_s11, %s1312_s11 }
  0x4b   : > { %p991_p11 = scmp.lt.s32.totalorder %s989_s10, %s982_s8 }
  0x4c   : > { %p985_p4 = pnand %p983_p13, %p943_p6 }
  0x4d   : > { %p992_p1 = por %p991_p11, %p990_p10 }
  0x4e   : > { %p986_p5 = pneg %p985_p4 }
  0x50   : > { %p993_p0 = pnand %p992_p1, %p986_p5 }
  0x52   : > { %996 = shalt.err (!%p993_p0)
}
  0x53   : > { %861 = dma.hbm_to_vmem [thread:$0]  (!%p1308_p2), %s1613_s3, 48, %s1312_s11, [#allocation9]  }
  0x54   : > { %s41_s15 = sadd.s32 1, %s1179_s22  ;;  %s235_s16 = sand.u32 1, %s1171_s20  }
  0x55   : > { %p43_p6 = scmp.ge.s32.totalorder %s41_s15, 2  ;;  %s1364_s17 = sshll.u32 %s235_s16, 4 }
  0x56   : > { %s1600_s12 = sshll.u32 %s1179_s22, 8  ;;  %s1615_s0 = sld [smem:[#allocation20_spill]] }
  0x57   : > { %s1634_s15 = smov (%p43_p6, %s41_s15), 0  ;;  %s239_s8 = scalar_lea.vmem [#allocation2], %s1364_s17 }
  0x58   : > { %1614 = sst [smem:[#allocation19_spill]] %s1634_s15  ;;  %s45_s11 = ssub.s32 %s1179_s22, %s1634_s15 }
  0x59   : > { %s248_s10 = sshll.u32 %s239_s8, 4  ;;  %p48_p2 = scmp.eq.s32.totalorder %s45_s11, 0  ;;  %s1379_s10 = int_to_ptr.vmem [resolvable:$true] %s248_s10 }
  0x5a   : > { %s1386_s14 = scalar_lea.sflag [#allocation3], %s235_s16  ;;  %p1616_p7 = scmp.ne.s32.totalorder %s1610_s9, 0 }
  0x5b   : > { %s1384_s13 = scalar_select %p48_p2, %s1171_s20, %s50_s26  }
  0x5c   : > { %s1374_s7 = scalar_lea.hbm %s1615_s0, %s1600_s12  ;;  %p999_p8 = pneg %p1616_p7 }
  0x5d   : > { %s997_s2 = scalar_lea.hbm %s1374_s7, 256  ;;  %s1002_s8 = scalar_lea.hbm %s1615_s0, 512 }
  0x5e   : > { %p998_p3 = scmp.ne.s32.totalorder %s1374_s7, %s997_s2  ;;  %p1003_p13 = scmp.lt.u32.totalorder %s1374_s7, %s1615_s0 }
  0x5f   : > { %p1004_p4 = scmp.lt.u32.totalorder %s1002_s8, %s997_s2  ;;  %p1006_p10 = scmp.lt.u32.totalorder %s997_s2, %s1374_s7 }
  0x60   : > { %p1000_p9 = pnand %p999_p8, %p998_p3 }
  0x61   : > { %p1005_p5 = por %p1004_p4, %p1003_p13 }
  0x62   : > { %p1001_p12 = pneg %p1000_p9 }
  0x63   : > { %p1007_p11 = por %p1006_p10, %p1005_p5 }
  0x65   : > { %p1008_p1 = pnand %p1007_p11, %p1001_p12 }
  0x67   : > { %1011 = shalt.err (!%p1008_p1)
}
  0x68   : > { %s1012_s26 = scalar_lea.vmem %s1379_s10, 256  ;;  %s1187_s16 = smov [#allocation2]  }
  0x69   : > { %p1013_p0 = scmp.ne.s32.totalorder %s1379_s10, %s1012_s26  ;;  %s1017_s25 = sshll.u32 %s1187_s16, 4  ;;  %s1018_s25 = int_to_ptr.vmem [resolvable:$false] %s1017_s25 }
  0x6a   : > { %s1019_s12 = scalar_lea.vmem %s1018_s25, 512  ;;  %p1020_p3 = scmp.lt.s32.totalorder %s1379_s10, %s1018_s25 }
  0x6b   : > { %p1015_p6 = pnand %p1013_p0, %p999_p8  ;;  %p1021_p9 = scmp.lt.s32.totalorder %s1019_s12, %s1012_s26 }
  0x6d   : > { %p1016_p2 = pneg %p1015_p6  ;;  %p1022_p13 = por %p1021_p9, %p1020_p3 }
  0x6f   : > { %p1023_p4 = pnand %p1022_p13, %p1016_p2 }
  0x71   : > { %1026 = shalt.err (!%p1023_p4)
}
  0x72   : > { %s1188_s2 = smov 128   ;;  %s1189_s27 = smov 8  }
  0x73   : > { %865 = dma.hbm_to_vmem [thread:$0]  (!%p1616_p7), %s1374_s7, 256, %s1379_s10, %s1386_s14, %s1188_s2, %s1188_s2, %s1189_s27  }
  0x74   : > { %s1617_s8 = sshll.u32 %s1179_s22, 8  ;;  %s262_s25 = scalar_lea.vmem [#allocation5], %s1364_s17 }
  0x75   : > { %s1422_s16 = scalar_lea.hbm %s1590_s1, %s1617_s8  ;;  %s271_s12 = sshll.u32 %s262_s25, 4  ;;  %s1426_s12 = int_to_ptr.vmem [resolvable:$true] %s271_s12 }
  0x76   : > { %s258_s0 = sand.u32 1, %s1183_s23   ;;  %s1027_s15 = scalar_lea.hbm %s1422_s16, 256 }
  0x77   : > { %s1428_s3 = scalar_lea.sflag [#allocation6], %s258_s0  ;;  %p1028_p12 = scmp.ne.s32.totalorder %s1422_s16, %s1027_s15 }
  0x78   : > { %s1032_s14 = scalar_lea.hbm %s1590_s1, 512  ;;  %p1033_p11 = scmp.lt.u32.totalorder %s1422_s16, %s1590_s1 }
  0x79   : > { %p1030_p5 = pnand %p1028_p12, %p999_p8  ;;  %p1034_p1 = scmp.lt.u32.totalorder %s1032_s14, %s1027_s15 }
  0x7a   : > { %p1036_p6 = scmp.lt.u32.totalorder %s1027_s15, %s1422_s16 }
  0x7b   : > { %p1031_p10 = pneg %p1030_p5  ;;  %p1035_p0 = por %p1034_p1, %p1033_p11 }
  0x7d   : > { %p1037_p2 = por %p1036_p6, %p1035_p0 }
  0x7f   : > { %p1038_p3 = pnand %p1037_p2, %p1031_p10 }
  0x81   : > { %1041 = shalt.err (!%p1038_p3)
}
  0x82   : > { %s1042_s0 = scalar_lea.vmem %s1426_s12, 256  ;;  %s1190_s17 = smov [#allocation5]  }
  0x83   : > { %p1043_p9 = scmp.ne.s32.totalorder %s1426_s12, %s1042_s0  ;;  %s1047_s26 = sshll.u32 %s1190_s17, 4  ;;  %s1048_s26 = int_to_ptr.vmem [resolvable:$false] %s1047_s26 }
  0x84   : > { %s1049_s25 = scalar_lea.vmem %s1048_s26, 512  ;;  %p1050_p12 = scmp.lt.s32.totalorder %s1426_s12, %s1048_s26 }
  0x85   : > { %p1045_p13 = pnand %p1043_p9, %p999_p8  ;;  %p1051_p5 = scmp.lt.s32.totalorder %s1049_s25, %s1042_s0 }
  0x87   : > { %p1046_p4 = pneg %p1045_p13  ;;  %p1052_p11 = por %p1051_p5, %p1050_p12 }
  0x89   : > { %p1053_p1 = pnand %p1052_p11, %p1046_p4 }
  0x8b   : > { %1056 = shalt.err (!%p1053_p1)
}
  0x8c   : > { %868 = dma.hbm_to_vmem [thread:$0]  (!%p1616_p7), %s1422_s16, 256, %s1426_s12, %s1428_s3, %s1188_s2, %s1188_s2, %s1189_s27  }
  0x8d   : > { %p1618_p8 = scmp.ne.s32.totalorder %s1609_s6, 0 }
  0x8e   : > { %s1460_s15 = sand.u32 (!%p1618_p8), 1, %s1167_s19   ;;  %p1619_p10 = scmp.ne.s32.totalorder (!%p1618_p8), %s1606_s28, 0 }
  0x8f   : > { %283 = sbr.rel (%p1618_p8) target bundleno = 534 (0x216), region = 36  ;;  %s1463_s7 = sshll.u32 (!%p1618_p8), %s1460_s15, 4 }
  0x90   : > { %s286_s9 = scalar_lea.sflag (!%p1618_p8), [#allocation3], %s1460_s15  ;;  %s289_s10 = scalar_lea.vmem (!%p1618_p8), [#allocation2], %s1463_s7 }
  0x96   : > { %1138 = dma.done.wait (%p1619_p10), %s286_s9, 256  }
  0x97   : > { %1140 = vsyncadd (%p1619_p10), %s286_s9, 4294967040  ;;  %s294_s3 = sand.u32 1, %s1261_s24   ;;  %s298_s2 = scalar_lea.vmem [#allocation5], %s1463_s7 }
  0x98   : > { %s295_s6 = scalar_lea.sflag [#allocation6], %s294_s3 }
  0x99   : > { %1142 = dma.done.wait (%p1619_p10), %s295_s6, 256  }
  0x9a   : > { %1144 = vsyncadd (%p1619_p10), %s295_s6, 4294967040  ;;  %p1620_p7 = scmp.eq.s32.totalorder %s1261_s24, 0 }
  0x9c   : > { %1146 = dma.done.wait (%p1620_p7), [#allocation6], 384   ;;  %p1621_p0 = pmov %p1620_p7 }
  0x9e   : > { %1148 = vsyncadd (%p1621_p0), [#allocation6], 4294966912  ;;  %p1622_p6 = pmov %p1621_p0 }
  0x9f   : > { %p1623_p2 = pmov %p1621_p0 }
  0xa0   : > { %1150 = dma.done.wait (%p1622_p6), [#allocation9], 48  }
  0xa1   : > { %1152 = vsyncadd (%p1623_p2), [#allocation9], 4294967248  ;;  %v1191_v0 = vmov 0.0   ;;  %v350_v1 = vld [vmem:[#allocation7 + $0x8] sm:$0xff]  ;;  %v351_v2 = vld [vmem:[#allocation7 + $0x10] sm:$0xff]  ;;  %vm369_vm0 = vcmask 64512   ;;  %v354_v14 = vlaneseq }
  0xa2   : > { %440 = vmatprep.mubr.f32.mxu0 %v1191_v0  ;;  %v349_v3 = vld [vmem:[#allocation7] sm:$0xff]  ;;  %376 = vmatprep.subr.mxu0 %v350_v1  ;;  %v348_v5 = vld [vmem:[%s289_s10 + $0x8] sm:$0xff]  ;;  %s1192_s24 = smov 32   ;;  %vm528_vm1 = vcmask 785408   ;;  %s335_s28 = scalar_lea.vmem [#allocation10], %s1463_s7 }
  0xa3   : > { %832 = vmatprep.subr.mxu1 %v351_v2  ;;  %v347_v4 = vld [vmem:[%s289_s10] sm:$0xff]  ;;  %377 = vmatpush1.msra.mxu0 %v349_v3  ;;  %v532_v7 = vld [vmem:[%s298_s2 + $0x8] sm:$0xff]  ;;  %v355_v15 = vshrl.u32 %v354_v14, 7  ;;  %s608_s27 = sshll.u32 %s335_s28, 4  ;;  %s828_s16 = sshll.u32 %s1175_s21, 8  ;;  %s1494_s27 = int_to_ptr.vmem [resolvable:$true] %s608_s27 }
  0xa4   : > { %833 = vmatpush3.msra.mxu1 %v351_v2  ;;  %834 = vmatprep.mubr.msk.f32.mxu1 %vm369_vm0, %v347_v4  ;;  %v531_v6 = vld [vmem:[%s298_s2] sm:$0xff]  ;;  %v352_v17 = vld [vmem:[#allocation8] sm:$0x7]  ;;  %s1500_s8 = scalar_lea.hbm %s1593_s4, %s828_s16  ;;  %s588_s11 = scalar_lea.sflag [#allocation4], %s1460_s15 }
  0xa5   : > { %812 = vmatmul.mubr.msk.f32.vlgmr.msra.gmra.mrb[0].mxu0 %vm369_vm0, %v347_v4  ;;  %835 = vmatmul.mubr.msk.f32.vlgmr.msra.gmra.mrb[0].mxu1 %vm369_vm0, %v348_v5  ;;  %v533_v8 = vpack.c.bf16 %v532_v7, %v531_v6  ;;  %v356_v16 = vsub.s32 0, %v355_v15  ;;  %v364_v18 = vsub.s32 2, %v355_v15  ;;  %v360_v21 = vsub.s32 1, %v355_v15  ;;  %s1057_s0 = scalar_lea.vmem %s1494_s27, 256  ;;  %p1624_p9 = scmp.ne.s32.totalorder %s1607_s29, 0 }
  0xa6   : > { %446 = vmatprep.mubr.f32.mxu0 %v1191_v0  ;;  %p1058_p3 = scmp.ne.s32.totalorder %s1494_s27, %s1057_s0  ;;  %s1193_s17 = smov [#allocation10]  }
  0xa7   : > { %555 = vrot.lane.b32.xlu0 %v533_v8, %s1192_s24  ;;  %v534_v9 = vunpack.c.l.bf16 %v533_v8  ;;  %v535_v10 = vunpack.c.h.bf16 %v533_v8  ;;  %v357_v19 = vrot.slane %v352_v17, %v356_v16  ;;  %v365_v20 = vrot.slane %v352_v17, %v364_v18  ;;  %s1061_s26 = sshll.u32 %s1193_s17, 4  ;;  %s1062_s26 = int_to_ptr.vmem [resolvable:$false] %s1061_s26 }
  0xa8   : > { %v361_v27 = vrot.slane %v352_v17, %v360_v21  ;;  %p1059_p13 = pnand %p1058_p3, %p1624_p9  ;;  %s1063_s25 = scalar_lea.vmem %s1062_s26, 512 }
  0xa9   : > { %813 = vmatmul.mubr.msk.f32.gmra.mrb[2].mxu0 %vm369_vm0, %v348_v5  ;;  %v1486_v11 = vsub.f32 %v531_v6, %v534_v9  ;;  %v1488_v12 = vsub.f32 %v532_v7, %v535_v10  ;;  %p1064_p12 = scmp.lt.s32.totalorder %s1494_s27, %s1062_s26  ;;  %p1065_p5 = scmp.lt.s32.totalorder %s1063_s25, %s1057_s0 }
  0xaa   : > { %p1060_p4 = pneg %p1059_p13 }
  0xab   : > { %v538_v13 = vpack.c.bf16 %v1488_v12, %v1486_v11  ;;  %p1066_p11 = por %p1065_p5, %p1064_p12 }
  0xad   : > { %p1067_p1 = pnand %p1066_p11, %p1060_p4 }
 0x178   : > { %v442_v22 = vpop.f32.mrb[0].mxu0  ;;  %v836_v24 = vpop.f32.mrb[0].mxu1 }
 0x179   : > { %v443_v23 = vadd.f32 %v442_v22, %v357_v19  ;;  %v444_v25 = vpop.f32.mrb[1].mxu0  ;;  %v525_v26 = vadd.f32 %v836_v24, %v365_v20  ;;  %v519_v28 = vpop.f32.mrb[1].mxu1 }
 0x17a   : > { %v520_v29 = vadd.f32 %v519_v28, %v365_v20  ;;  %v445_v34 = vadd.f32 %v444_v25, %v361_v27 }
 0x17b   : > { %529 = vst.msk [vmem:[%s335_s28] sm:$0xff] %vm528_vm1, %v443_v23 }
 0x17c   : > { %v448_v30 = vpop.f32.mrb[2].mxu0  ;;  %v541_v31 = vpack.c.bf16 %v525_v26, %v520_v29 }
 0x17d   : > { %v449_v32 = vadd.f32 %v448_v30, %v357_v19  ;;  %v450_v33 = vpop.f32.mrb[3].mxu0 }
 0x17e   : > { %v451_v35 = vadd.f32 %v450_v33, %v361_v27  ;;  %549 = vrot.lane.b32.xlu0 %v541_v31, %s1192_s24 }
 0x17f   : > { %530 = vst.msk [vmem:[%s335_s28 + $0x8] sm:$0xff] %vm528_vm1, %v449_v32  ;;  %v539_v36 = vpack.c.bf16 %v449_v32, %v443_v23 }
 0x180   : > { %v540_v37 = vpack.c.bf16 %v451_v35, %v445_v34 }
 0x181   : > { %1070 = shalt.err (!%p1067_p1)
}
 0x182   : > { %s1071_s7 = scalar_lea.hbm %s1500_s8, 256  ;;  %s1075_s3 = scalar_lea.hbm %s1593_s4, 512 }
 0x183   : > { %p1072_p8 = scmp.ne.s32.totalorder %s1500_s8, %s1071_s7  ;;  %p1076_p0 = scmp.lt.u32.totalorder %s1500_s8, %s1593_s4 }
 0x184   : > { %p1077_p6 = scmp.lt.u32.totalorder %s1075_s3, %s1071_s7  ;;  %p1079_p3 = scmp.lt.u32.totalorder %s1071_s7, %s1500_s8 }
 0x185   : > { %p1073_p10 = pnand %p1072_p8, %p1624_p9 }
 0x186   : > { %p1078_p2 = por %p1077_p6, %p1076_p0 }
 0x187   : > { %p1074_p7 = pneg %p1073_p10 }
 0x188   : > { %p1080_p13 = por %p1079_p3, %p1078_p2 }
 0x18a   : > { %p1081_p4 = pnand %p1080_p13, %p1074_p7 }
 0x18c   : > { %1084 = shalt.err (!%p1081_p4)
}
 0x18d   : > { %s1194_s28 = smov 128   ;;  %s1195_s16 = smov 8   ;;  %545 = vrot.lane.b32.xlu1 %v539_v36, %s1192_s24  ;;  %v556_v38 = vpop.permute.xlu0 %555  ;;  %vm551_vm2 = vcmask 261120   ;;  %vm564_vm3 = vcmask 285696   ;;  %vm583_vm4 = vcmask 306176  }
 0x18e   : > { %851 = dma.vmem_to_hbm [thread:$0]  (%p1624_p9), %s1494_s27, 256, %s1500_s8, %s588_s11, %s1194_s28, %s1194_s28, %s1195_s16  }
 0x18f   : > { %s1196_s12 = smov 35   ;;  %s837_s14 = smul.u32 24, %s1460_s15 }
 0x190   : > { %558 = vrot.lane.b32.xlu0 %v538_v13, %s1196_s12  ;;  %s838_s26 = smul.u32 384, %s1175_s21  ;;  %s593_s21 = scalar_lea.sflag [#allocation12], %s1460_s15 }
 0x191   : > { %547 = vrot.lane.b32.xlu1 %v540_v37, %s1192_s24  ;;  %s342_s0 = scalar_lea.vmem [#allocation11], %s837_s14  ;;  %s1197_s25 = smov [#allocation11]  }
 0x192   : > { %s627_s17 = sshll.u32 %s342_s0, 4  ;;  %s1540_s8 = scalar_lea.hbm %s1594_s5, %s838_s26  ;;  %s1535_s17 = int_to_ptr.vmem [resolvable:$true] %s627_s17 }
 0x193   : > { %s1085_s11 = scalar_lea.vmem %s1535_s17, 384  ;;  %s1089_s7 = sshll.u32 %s1197_s25, 4  ;;  %s1090_s7 = int_to_ptr.vmem [resolvable:$false] %s1089_s7 }
 0x194   : > { %p1086_p12 = scmp.ne.s32.totalorder %s1535_s17, %s1085_s11  ;;  %s1091_s9 = scalar_lea.vmem %s1090_s7, 768 }
 0x195   : > { %p1092_p1 = scmp.lt.s32.totalorder %s1535_s17, %s1090_s7  ;;  %p1093_p8 = scmp.lt.s32.totalorder %s1091_s9, %s1085_s11 }
 0x196   : > { %p1087_p5 = pnand %p1086_p12, %p1624_p9 }
 0x197   : > { %p1094_p10 = por %p1093_p8, %p1092_p1 }
 0x198   : > { %p1088_p11 = pneg %p1087_p5 }
 0x19a   : > { %p1095_p7 = pnand %p1094_p10, %p1088_p11 }
 0x1f0   : > { %v550_v39 = vpop.permute.xlu0 %549 }
 0x1f1   : > { %v563_v41 = vsel %vm551_vm2, %v550_v39, %v556_v38 }
 0x1ff   : > { %v546_v40 = vpop.permute.xlu1 %545 }
 0x202   : > { %v559_v42 = vpop.permute.xlu0 %558 }
 0x203   : > { %v566_v43 = vsel %vm564_vm3, %v563_v41, %v559_v42  ;;  %v548_v46 = vpop.permute.xlu1 %547 }
 0x204   : > { %v817_v44 = vcombine.low %v566_v43, %v566_v43  ;;  %v819_v45 = vcombine.high %v566_v43, %v566_v43  ;;  %v552_v47 = vsel %vm551_vm2, %v546_v40, %v548_v46  ;;  %v553_v48 = vsel %vm551_vm2, %v548_v46, %v550_v39 }
 0x205   : > { %v816_v49 = vcombine.low %v552_v47, %v553_v48  ;;  %v818_v50 = vcombine.high %v552_v47, %v553_v48 }
 0x206   : > { %584 = vst.msk [vmem:[%s342_s0 + $0x8] sm:$0xf] %vm583_vm4, %v817_v44  ;;  %586 = vst.msk [vmem:[%s342_s0 + $0x14] sm:$0xf] %vm583_vm4, %v819_v45 }
 0x207   : > { %582 = vst [vmem:[%s342_s0] sm:$0xff] %v816_v49  ;;  %585 = vst [vmem:[%s342_s0 + $0xc] sm:$0xff] %v818_v50 }
 0x208   : > { %1098 = shalt.err (!%p1095_p7)
}
 0x209   : > { %s1099_s10 = scalar_lea.hbm %s1540_s8, 384  ;;  %s1103_s2 = scalar_lea.hbm %s1594_s5, 768 }
 0x20a   : > { %p1100_p0 = scmp.ne.s32.totalorder %s1540_s8, %s1099_s10  ;;  %p1104_p3 = scmp.lt.u32.totalorder %s1540_s8, %s1594_s5 }
 0x20b   : > { %p1105_p13 = scmp.lt.u32.totalorder %s1103_s2, %s1099_s10  ;;  %p1107_p12 = scmp.lt.u32.totalorder %s1099_s10, %s1540_s8 }
 0x20c   : > { %p1101_p6 = pnand %p1100_p0, %p1624_p9 }
 0x20d   : > { %p1106_p4 = por %p1105_p13, %p1104_p3 }
 0x20e   : > { %p1102_p2 = pneg %p1101_p6 }
 0x20f   : > { %p1108_p5 = por %p1107_p12, %p1106_p4 }
 0x211   : > { %p1109_p11 = pnand %p1108_p5, %p1102_p2 }
 0x213   : > { %1112 = shalt.err (!%p1109_p11)
}
 0x214   : > { %s1198_s12 = smov 192   ;;  %s1199_s14 = smov 12  }
 0x215   : > { %852 = dma.vmem_to_hbm [thread:$0]  (%p1624_p9), %s1535_s17, 384, %s1540_s8, %s593_s21, %s1198_s12, %s1198_s12, %s1199_s14  }
 0x216 PF: > { %s642_s0 = sand.u32 1, %s1163_s18   ;;  %p1625_p1 = scmp.ne.s32.totalorder %s1608_s30, 0 }
 0x217   : > { %p1626_p8 = scmp.ge.s32.totalorder %s1183_s23, 2  ;;  %s643_s26 = scalar_lea.sflag [#allocation4], %s642_s0 }
 0x219   : > { %p870_p10 = pnand %p1626_p8, %p1625_p1 }
 0x21b   : > { %1154 = dma.done.wait (!%p870_p10), %s643_s26, 256  }
 0x21c   : > { %1156 = vsyncadd (!%p870_p10), %s643_s26, 4294967040  ;;  %s652_s24 = scalar_lea.sflag [#allocation12], %s642_s0 }
 0x21d   : > { %1158 = dma.done.wait (!%p870_p10), %s652_s24, 384  }
 0x21e   : > { %1160 = vsyncadd (!%p870_p10), %s652_s24, 4294966912  ;;  %s29_s23 = sadd.s32 1, %s1183_s23   ;;  %s1627_s29 = sld [smem:[#allocation19_spill]] }
 0x21f   : > { %p26_p7 = scmp.ge.s32.totalorder %s29_s23, 4   ;;  %s1628_s18 = smov %s1167_s19 }
 0x220   : > { %s1629_s19 = smov %s1171_s20  ;;  %s1630_s20 = smov %s1384_s13 }
 0x221   : > { %s1631_s21 = smov %s1179_s22  ;;  %28 = sbr.rel (!%p26_p7) target bundleno = 15 (0xf), region = 119 }
 0x224   : > { %s1632_s22 = smov %s1627_s29 }
 0x228   :  { %657 = vsyncpa [#allocation3], 1 }
 0x229   :  { %659 = vsyncpa [#allocation3 + $0x1], 1 }
 0x22a   :  { %660 = vsyncpa [#allocation6], 1 }
 0x22b   :  { %662 = vsyncpa [#allocation6 + $0x1], 1 }
 0x22c   :  { %663 = vsyncpa [#allocation9], 1 }
 0x22d   :  { %664 = vsyncpa [#allocation4], 1 }
 0x22e   :  { %666 = vsyncpa [#allocation4 + $0x1], 1 }
 0x22f   :  { %667 = vsyncpa [#allocation12], 1 }
 0x230   :  { %669 = vsyncpa [#allocation12 + $0x1], 1 }

</bundles_post_ra>
